<compile_context>
chip_gen: v7x
topology: tpu7x:2x2x1
jax: 0.10.0
libtpu: 0.0.40
codegen_flags: <defaults>
</compile_context>

<pallas_src>
import numpy as np
import jax
import jax.numpy as jnp
from jax import lax
from jax.experimental import pallas as pl
from jax.experimental.pallas import tpu as pltpu


_LANE = 128
_MIN_TILE = 8 * _LANE          # one (8,128) f32 vreg tile = 4 KiB
_MAX_TILE = 512 * 1024         # 2 MiB f32 per block; 2 streams x 2 bufs = 8 MiB VMEM
_MIN_STEPS = 4                 # keep the pipeline fed / both v7x TCs busy
_PAD_COORD = -1e4              # assumes real coords are normalized-ish (>> -1e4)


def _round_up(x, m):
    return (x + m - 1) // m * m


def _matcher_kernel(bounds_ref, coords_ref, out_ref):
    # bounds_ref: [4*bs] f32 in SMEM, per batch: (xmin, xmax, ymin, ymax)
    # coords_ref / out_ref: [tile_r, 128] f32 blocks (batch dim squeezed);
    #   lanes are the interleaved (x, y) stream: even flat index = x, odd = y.
    b = pl.program_id(0)
    xmin = bounds_ref[4 * b + 0]
    xmax = bounds_ref[4 * b + 1]
    ymin = bounds_ref[4 * b + 2]
    ymax = bounds_ref[4 * b + 3]

    c = coords_ref[...]                                   # (tile_r, 128)
    lane = lax.broadcasted_iota(jnp.int32, c.shape, 1)    # lane index 0..127
    even = (lane & 1) == 0                                 # even lane -> x coord

    # "next lane" value c[i+1]: pair each x with its y.  Two XLU rolls + a
    # constant select make this correct regardless of the hardware rotate
    # direction convention (the rolled iota identifies which roll is c[i+1]).
    r_a = pltpu.roll(c, 127, axis=1)
    r_b = pltpu.roll(c, 1, axis=1)
    l_a = pltpu.roll(lane, 127, axis=1)
    nxt = jnp.where(l_a == lane + 1, r_a, r_b)             # == c[i+1] for lanes < 127

    # Per-lane bound selection: lane value `c` uses its own axis's bounds, the
    # partner `nxt` uses the other axis's bounds.  (Scalar -> vector broadcast.)
    a_min = jnp.where(even, xmin, ymin)
    a_max = jnp.where(even, xmax, ymax)
    b_min = jnp.where(even, ymin, xmin)
    b_max = jnp.where(even, ymax, xmax)

    la = c - a_min
    ra = a_max - c
    lb = nxt - b_min
    rb = b_max - nxt

    min_a = jnp.minimum(la, ra)
    max_a = jnp.maximum(la, ra)
    min_b = jnp.minimum(lb, rb)
    max_b = jnp.maximum(lb, rb)

    # inside == (l>0)&(r>0)&(t>0)&(d>0); centerness = sqrt(min_x/max_x * min_y/max_y)
    inside = (min_a > 0.0) & (min_b > 0.0)
    num = jnp.maximum(min_a * min_b, 0.0)
    den = jnp.where(inside, max_a * max_b, 1.0)
    cen = jnp.sqrt(num) * lax.rsqrt(den)                   # sqrt/rsqrt on the EUP

    # -1.0 sentinel encodes "outside"; inside centerness is always > 0.
    # Only even lanes (real query slots) are read back on the host.
    out_ref[...] = jnp.where(inside, cen, -1.0)


def _matcher_pallas(coords, bounds):
    """Dense per-query centerness from the interleaved coordinate stream.

    coords: [bs, nq, 2] float32 query coordinates (x, y).
    bounds: [4*bs] float32, per batch (xmin, xmax, ymin, ymax).
    Returns [bs, 2*nq_pad] float32 (padded, interleaved): element 2q holds the
    centerness of query q if inside the box else -1.0; odd / padded elements
    are don't-care.
    """
    coords = jnp.asarray(coords, jnp.float32)
    bounds = jnp.asarray(bounds, jnp.float32).reshape(-1)
    bs, nq = coords.shape[0], coords.shape[1]

    total = 2 * nq                      # interleaved (x, y) stream per batch row
    flat = coords.reshape(bs, total)    # free view -> no extra XLA pass

    # Tile sizing: as big as 2 MiB per block, but keep >= ~_MIN_STEPS grid steps.
    steps_per_batch = max(1, -(-_MIN_STEPS // max(bs, 1)))
    tile = _round_up(max(-(-total // steps_per_batch), 1), _MIN_TILE)
    tile = max(_MIN_TILE, min(_MAX_TILE, tile))

    total_pad = _round_up(total, tile)
    pad = total_pad - total
    if pad:
        # Single pad pass (none at all when 2*nq is tile-aligned).  The pad
        # coordinate lies far outside any normalized box -> padded lanes -1.0.
        flat = jnp.pad(flat, ((0, 0), (0, pad)), constant_values=_PAD_COORD)

    rows = total_pad // _LANE           # multiple of 8
    tile_r = tile // _LANE              # multiple of 8
    coords3 = flat.reshape(bs, rows, _LANE)

    grid = (bs, rows // tile_r)
    blk = pl.BlockSpec((None, tile_r, _LANE), lambda b, t: (b, t, 0))

    out = pl.pallas_call(
        _matcher_kernel,
        out_shape=jax.ShapeDtypeStruct((bs, rows, _LANE), jnp.float32),
        grid=grid,
        in_specs=[
            pl.BlockSpec(memory_space=pltpu.MemorySpace.SMEM),  # bounds (1-D, whole)
            blk,                                                # interleaved coords
        ],
        out_specs=blk,
        compiler_params=pltpu.CompilerParams(
            dimension_semantics=("parallel", "parallel")),
    )(bounds, coords3)

    # No device-side [:, :nq] slice: return the padded dense output as-is.
    return out.reshape(bs, total_pad)


def tracking_matcher(outputs, targets):
    """JAX/Pallas equivalent of TrackingMatcher.forward.

    outputs: dict with 'bilinear_coords': [bs, num_queries, 2] float array
    targets: list (len = bs) of dicts with 'boxes': [1, 4] array (cx, cy, w, h)

    Returns (indices, centernesses) with the same ragged structure as the
    PyTorch module (numpy int64 index arrays, concatenated float centerness).
    """
    coords = jnp.asarray(outputs['bilinear_coords'], dtype=jnp.float32)
    bs, num_queries = coords.shape[:2]

    box = jnp.stack(
        [jnp.asarray(targets[i]['boxes'][0], dtype=jnp.float32) for i in range(bs)],
        axis=0,
    )  # [bs, 4] (cx, cy, w, h)
    cx, cy, w, h = box[:, 0], box[:, 1], box[:, 2], box[:, 3]
    bounds = jnp.stack(
        [cx - w * 0.5, cx + w * 0.5, cy - h * 0.5, cy + h * 0.5],
        axis=1).reshape(-1)  # flat [4*bs]: (xmin, xmax, ymin, ymax) per batch

    dense = _matcher_pallas(coords, bounds)          # [bs, 2*nq_pad] padded
    dense = np.asarray(jax.device_get(dense))        # single D2H transfer
    # Even interleaved slots hold the per-query value; drop odd/padded slots here.
    cen = dense.reshape(bs, -1, 2)[:, :num_queries, 0]

    # TODO(synk): ragged (data-dependent length) index extraction has no clean
    # Pallas equivalent; done on host from the dense (-1 = outside) kernel output.
    indices = []
    cen_list = []
    for i in range(bs):
        m = cen[i] >= 0.0
        sel = np.nonzero(m)[0].astype(np.int64)
        indices.append((sel, np.zeros(len(sel), dtype=np.int64)))
        cen_list.append(cen[i][m].astype(np.float64))

    return indices, (np.concatenate(cen_list) if cen_list else np.zeros((0,), np.float64))


def _numpy_reference(outputs, targets):
    coords_all = np.asarray(outputs['bilinear_coords'], dtype=np.float64)
    bs, num_queries = coords_all.shape[:2]
    indices, cens = [], []
    for i in range(bs):
        cx, cy, w, h = [float(v) for v in np.asarray(targets[i]['boxes'][0])]
        xmin, ymin, xmax, ymax = cx - w / 2, cy - h / 2, cx + w / 2, cy + h / 2
        coords = coords_all[i]
        left = coords[:, 0] - xmin
        right = xmax - coords[:, 0]
        top = coords[:, 1] - ymin
        down = ymax - coords[:, 1]
        index = (left > 0) & (right > 0) & (top > 0) & (down > 0)
        cx_ = ((left[index] + right[index]) / 2 - np.abs(left[index] - right[index]) / 2) / (
            (left[index] + right[index]) / 2 + np.abs(left[index] - right[index]) / 2)
        cy_ = ((top[index] + down[index]) / 2 - np.abs(top[index] - down[index]) / 2) / (
            (top[index] + down[index]) / 2 + np.abs(top[index] - down[index]) / 2)
        cens.append(np.sqrt(cx_ * cy_))
        sel = np.arange(num_queries)[index]
        indices.append((sel.astype(np.int64), np.zeros(len(sel), dtype=np.int64)))
    return indices, np.concatenate(cens) if cens else np.zeros((0,), np.float64)


if __name__ == "__main__":
    key = jax.random.PRNGKey(0)
    bs, num_queries = 2, 8

    k1, _ = jax.random.split(key)
    bilinear_coords = jax.random.uniform(k1, (bs, num_queries, 2), dtype=jnp.float32)

    outputs = {"bilinear_coords": bilinear_coords}
    targets = [
        {"labels": jnp.array([0]), "boxes": jnp.array([[0.5, 0.5, 0.6, 0.6]], jnp.float32)},
        {"labels": jnp.array([0]), "boxes": jnp.array([[0.3, 0.7, 0.4, 0.5]], jnp.float32)},
    ]

    # Direct Pallas kernel run (dense padded output) + block on the result.
    box = jnp.concatenate([t["boxes"] for t in targets], axis=0)
    bounds = jnp.stack(
        [box[:, 0] - box[:, 2] * 0.5, box[:, 0] + box[:, 2] * 0.5,
         box[:, 1] - box[:, 3] * 0.5, box[:, 1] + box[:, 3] * 0.5],
        axis=1).reshape(-1)
    dense = _matcher_pallas(bilinear_coords, bounds)
    jax.block_until_ready(dense)

    # Full module-equivalent path (kernel + host-side ragged assembly).
    indices, centernesses = tracking_matcher(outputs, targets)
    ref_indices, ref_cens = _numpy_reference(outputs, targets)

    for (a, b), (ra, rb) in zip(indices, ref_indices):
        assert np.array_equal(a, ra) and np.array_equal(b, rb)
    assert np.allclose(centernesses, ref_cens, rtol=1e-5, atol=1e-6)

    print("KERNEL_OK")
</pallas_src>

<mosaic_0001>
module attributes {stable_mosaic.version = 11 : i64} {
  func.func @_matcher_kernel(%arg0: i32, %arg1: i32, %arg2: memref<8xf32, #tpu.memory_space<smem>>, %arg3: memref<1x8x128xf32, #tpu.memory_space<vmem>>, %arg4: memref<1x8x128xf32, #tpu.memory_space<vmem>>) attributes {dimension_semantics = [#tpu.dimension_semantics<parallel>, #tpu.dimension_semantics<parallel>], iteration_bounds = array<i64: 2, 1>, scalar_prefetch = 0 : i64, scratch_operands = 0 : i64, tpu.core_type = #tpu.core_type<tc>, window_params = [{transform_indices = @transform_0, window_bounds = array<i64: 8>}, {transform_indices = @transform_1, window_bounds = array<i64: 1, 8, 128>}, {transform_indices = @transform_2, window_bounds = array<i64: 1, 8, 128>}]} {
    %c4_i32 = arith.constant 4 : i32
    %0 = arith.muli %c4_i32, %arg0 : i32
    %c0_i32 = arith.constant 0 : i32
    %1 = arith.addi %0, %c0_i32 : i32
    %2 = arith.index_cast %1 : i32 to index
    %3 = memref.load %arg2[%2] : memref<8xf32, #tpu.memory_space<smem>>
    %c4_i32_0 = arith.constant 4 : i32
    %4 = arith.muli %c4_i32_0, %arg0 : i32
    %c1_i32 = arith.constant 1 : i32
    %5 = arith.addi %4, %c1_i32 : i32
    %6 = arith.index_cast %5 : i32 to index
    %7 = memref.load %arg2[%6] : memref<8xf32, #tpu.memory_space<smem>>
    %c4_i32_1 = arith.constant 4 : i32
    %8 = arith.muli %c4_i32_1, %arg0 : i32
    %c2_i32 = arith.constant 2 : i32
    %9 = arith.addi %8, %c2_i32 : i32
    %10 = arith.index_cast %9 : i32 to index
    %11 = memref.load %arg2[%10] : memref<8xf32, #tpu.memory_space<smem>>
    %c4_i32_2 = arith.constant 4 : i32
    %12 = arith.muli %c4_i32_2, %arg0 : i32
    %c3_i32 = arith.constant 3 : i32
    %13 = arith.addi %12, %c3_i32 : i32
    %14 = arith.index_cast %13 : i32 to index
    %15 = memref.load %arg2[%14] : memref<8xf32, #tpu.memory_space<smem>>
    %c0 = arith.constant 0 : index
    %c0_3 = arith.constant 0 : index
    %c0_4 = arith.constant 0 : index
    %16 = vector.load %arg3[%c0, %c0_3, %c0_4] : memref<1x8x128xf32, #tpu.memory_space<vmem>>, vector<1x8x128xf32>
    %17 = vector.shape_cast %16 : vector<1x8x128xf32> to vector<8x128xf32>
    %18 = tpu.iota {dimensions = array<i32: 1>} : vector<8x128xi32>
    %c1_i32_5 = arith.constant 1 : i32
    %19 = vector.broadcast %c1_i32_5 : i32 to vector<8x128xi32>
    %20 = arith.andi %18, %19 : vector<8x128xi32>
    %c0_i32_6 = arith.constant 0 : i32
    %21 = vector.broadcast %c0_i32_6 : i32 to vector<8x128xi32>
    %22 = arith.cmpi eq, %20, %21 : vector<8x128xi32>
    %c127_i32 = arith.constant 127 : i32
    %23 = tpu.dynamic_rotate %17 by %c127_i32 dim 1 : vector<8x128xf32>, i32 -> vector<8x128xf32>
    %c1_i32_7 = arith.constant 1 : i32
    %24 = tpu.dynamic_rotate %17 by %c1_i32_7 dim 1 : vector<8x128xf32>, i32 -> vector<8x128xf32>
    %c127_i32_8 = arith.constant 127 : i32
    %25 = tpu.dynamic_rotate %18 by %c127_i32_8 dim 1 : vector<8x128xi32>, i32 -> vector<8x128xi32>
    %c1_i32_9 = arith.constant 1 : i32
    %26 = vector.broadcast %c1_i32_9 : i32 to vector<8x128xi32>
    %27 = arith.addi %18, %26 : vector<8x128xi32>
    %28 = arith.cmpi eq, %25, %27 : vector<8x128xi32>
    %29 = arith.select %28, %23, %24 : vector<8x128xi1>, vector<8x128xf32>
    %30 = vector.broadcast %3 : f32 to vector<8x128xf32>
    %31 = vector.broadcast %11 : f32 to vector<8x128xf32>
    %32 = arith.select %22, %30, %31 : vector<8x128xi1>, vector<8x128xf32>
    %33 = vector.broadcast %7 : f32 to vector<8x128xf32>
    %34 = vector.broadcast %15 : f32 to vector<8x128xf32>
    %35 = arith.select %22, %33, %34 : vector<8x128xi1>, vector<8x128xf32>
    %36 = vector.broadcast %11 : f32 to vector<8x128xf32>
    %37 = vector.broadcast %3 : f32 to vector<8x128xf32>
    %38 = arith.select %22, %36, %37 : vector<8x128xi1>, vector<8x128xf32>
    %39 = vector.broadcast %15 : f32 to vector<8x128xf32>
    %40 = vector.broadcast %7 : f32 to vector<8x128xf32>
    %41 = arith.select %22, %39, %40 : vector<8x128xi1>, vector<8x128xf32>
    %42 = arith.subf %17, %32 : vector<8x128xf32>
    %43 = arith.subf %35, %17 : vector<8x128xf32>
    %44 = arith.subf %29, %38 : vector<8x128xf32>
    %45 = arith.subf %41, %29 : vector<8x128xf32>
    %46 = arith.minimumf %42, %43 : vector<8x128xf32>
    %47 = arith.maximumf %42, %43 : vector<8x128xf32>
    %48 = arith.minimumf %44, %45 : vector<8x128xf32>
    %49 = arith.maximumf %44, %45 : vector<8x128xf32>
    %cst = arith.constant 0.000000e+00 : f32
    %50 = vector.broadcast %cst : f32 to vector<8x128xf32>
    %51 = arith.cmpf ogt, %46, %50 : vector<8x128xf32>
    %cst_10 = arith.constant 0.000000e+00 : f32
    %52 = vector.broadcast %cst_10 : f32 to vector<8x128xf32>
    %53 = arith.cmpf ogt, %48, %52 : vector<8x128xf32>
    %54 = arith.andi %51, %53 : vector<8x128xi1>
    %55 = arith.mulf %46, %48 : vector<8x128xf32>
    %cst_11 = arith.constant 0.000000e+00 : f32
    %56 = vector.broadcast %cst_11 : f32 to vector<8x128xf32>
    %57 = arith.maximumf %55, %56 : vector<8x128xf32>
    %58 = arith.mulf %47, %49 : vector<8x128xf32>
    %cst_12 = arith.constant 1.000000e+00 : f32
    %59 = vector.broadcast %cst_12 : f32 to vector<8x128xf32>
    %60 = arith.select %54, %58, %59 : vector<8x128xi1>, vector<8x128xf32>
    %61 = math.sqrt %57 : vector<8x128xf32>
    %62 = math.rsqrt %60 : vector<8x128xf32>
    %63 = arith.mulf %61, %62 : vector<8x128xf32>
    %cst_13 = arith.constant -1.000000e+00 : f32
    %64 = vector.broadcast %cst_13 : f32 to vector<8x128xf32>
    %65 = arith.select %54, %63, %64 : vector<8x128xi1>, vector<8x128xf32>
    %c0_14 = arith.constant 0 : index
    %c0_15 = arith.constant 0 : index
    %c0_16 = arith.constant 0 : index
    %66 = vector.load %arg4[%c0_14, %c0_15, %c0_16] : memref<1x8x128xf32, #tpu.memory_space<vmem>>, vector<1x8x128xf32>
    %67 = vector.shape_cast %66 : vector<1x8x128xf32> to vector<8x128xf32>
    %68 = vector.shape_cast %65 : vector<8x128xf32> to vector<1x8x128xf32>
    tpu.vector_store %arg4[%c0_14, %c0_15, %c0_16], %68 {strides = array<i32>} : memref<1x8x128xf32, #tpu.memory_space<vmem>>, vector<1x8x128xf32>,
    return
  }
  func.func @transform_0(%arg0: i32, %arg1: i32) -> i32 {
    %c0_i32 = arith.constant 0 : i32
    %c0_i32_0 = arith.constant 0 : i32
    return %c0_i32 : i32
  }
  func.func @transform_1(%arg0: i32, %arg1: i32) -> (i32, i32, i32) {
    %c0_i32 = arith.constant 0 : i32
    %c0_i32_0 = arith.constant 0 : i32
    return %arg0, %arg1, %c0_i32 : i32, i32, i32
  }
  func.func @transform_2(%arg0: i32, %arg1: i32) -> (i32, i32, i32) {
    %c0_i32 = arith.constant 0 : i32
    %c0_i32_0 = arith.constant 0 : i32
    return %arg0, %arg1, %c0_i32 : i32, i32, i32
  }
}

</mosaic_0001>

<bundles_post_ra>
// kernel: tpu_custom_call.1
= control target key start
LH: loop header
LB: loop body
LE: loop exit
PB: predicated region body
PF: predicated region fallthrough
CT: control target
= control target key end

     0   :  { %7 = vsyncpa [#allocation5], 0  ;;  %s836_s0 = inlined_call_operand.hbm [shape: f32[8], index: 0, kind: input, shape index: {}]   ;;  %s837_s1 = inlined_call_operand.hbm [shape: f32[2,8,128], index: 1, kind: input, shape index: {}]   ;;  %s838_s2 = inlined_call_operand.hbm [shape: f32[2,8,128], index: 2, kind: output, shape index: {}]  }
   0x1   :  { %8 = vsyncpa [#allocation3], 0 }
   0x2   :  { %10 = vsyncpa [#allocation3 + $0x1], 0 }
   0x3   :  { %11 = vsyncpa [#allocation4], 0 }
   0x4   :  { %13 = vsyncpa [#allocation4 + $0x1], 0  ;;  %s597_s9 = smov 0   ;;  %s599_s10 = smov 0  }
   0x5   :  { %s601_s11 = smov 0   ;;  %s603_s12 = smov 0  }
   0x6   :  { %s605_s13 = smov 0   ;;  %s607_s14 = smov 0  }
   0x7 LB: > { %s351_s15 = sadd.s32 4294967295, %s575_s14   ;;  %s352_s16 = sadd.s32 4294967294, %s575_s14   ;;  %s575_s14 = sphi %s607_s14, %s19_s14   ;;  %s571_s13 = sphi %s605_s13, %s864_s13   ;;  %s567_s12 = sphi %s603_s12, %s863_s12   ;;  %s563_s11 = sphi %s601_s11, %s862_s11   ;;  %s559_s10 = sphi %s599_s10, %s861_s10   ;;  %s555_s9 = sphi %s597_s9, %s860_s9  }
   0x8   : > { %p74_p0 = scmp.ne.s32.totalorder %s559_s10, %s555_s9  ;;  %p631_p1 = scmp.eq.s32.totalorder %s351_s15, 0 }
   0x9   : > { %p635_p2 = scmp.eq.s32.totalorder %s351_s15, 1  ;;  %p106_p3 = scmp.eq.s32.totalorder %s352_s16, 1 }
   0xa   : > { %s843_s17 = scalar_select %p631_p1, 1, 0 }
   0xb   : > { %p641_p4 = por %p631_p1, %p74_p0  ;;  %p353_p5 = scmp.ge.s32.totalorder %s575_s14, 1 }
   0xc   : > { %p646_p6 = por %p106_p3, %p74_p0  ;;  %p113_p7 = scmp.lt.s32.totalorder %s575_s14, 3 }
   0xd   : > { %s845_s19 = scalar_select %p641_p4, 1, 0 }
   0xe   : > { %s846_s20 = scalar_select %p646_p6, 1, 0 }
   0xf   : > { %p651_p8 = pnand %p353_p5, %p113_p7  ;;  %s31_s22 = sadd.s32 1, %s571_s13 }
  0x10   : > { %p665_p12 = scmp.ge.s32.totalorder %s31_s22, 2  ;;  %s61_s25 = sadd.s32 1, %s563_s11 }
  0x11   : > { %p375_p10 = pneg %p651_p8  ;;  %p68_p13 = scmp.ne.s32.totalorder %s563_s11, %s559_s10 }
  0x12   : > { %p69_p0 = scmp.eq.s32.totalorder %s575_s14, 0  ;;  %s446_s28 = scalar_lea.hbm %s836_s0, 16 }
  0x13   : > { %p661_p11 = pnand %p375_p10, %p631_p1  ;;  %p447_p3 = scmp.ne.s32.totalorder %s836_s0, %s446_s28 }
  0x14   : > { %p453_p9 = scmp.lt.u32.totalorder %s446_s28, %s836_s0 }
  0x15   : > { %p448_p5 = pneg %p661_p11 }
  0x17   : > { %p449_p7 = pnand %p448_p5, %p447_p3 }
  0x19   : > { %p450_p10 = pneg %p449_p7 }
  0x1b   : > { %p455_p6 = pnand %p453_p9, %p450_p10 }
  0x1d   : > { %458 = shalt.err (!%p455_p6)
}
  0x1e   : > { %s577_s5 = smov [#allocation2]   ;;  %s866_s22 = smov (%p665_p12, %s31_s22), 0 }
  0x1f   : > { %378 = dma.hbm_to_smem (!%p661_p11), %s836_s0, 16, %s577_s5, [#allocation5]  }
  0x20   : > { %p696_p6 = por %p69_p0, %p68_p13  ;;  %p705_p9 = por %p635_p2, %p68_p13 }
  0x21   : > { %s56_s16 = ssub.s32 %s571_s13, %s866_s22  ;;  %p388_p3 = scmp.lt.s32.totalorder %s575_s14, 2 }
  0x22   : > { %s851_s15 = scalar_select %p705_p9, 1, 0 }
  0x23   : > { %p59_p5 = scmp.eq.s32.totalorder %s56_s16, 0  ;;  %s135_s23 = sand.u32 1, %s563_s11  }
  0x24   : > { %s356_s24 = sshll.u32 %s135_s23, 3  ;;  %s357_s27 = sshll.u32 %s571_s13, 7 }
  0x25   : > { %s714_s26 = scalar_select %p59_p5, %s563_s11, %s61_s25  }
  0x26   : > { %s720_s30 = scalar_lea.hbm %s837_s1, %s357_s27  ;;  %s139_s18 = scalar_lea.vmem [#allocation6], %s356_s24 }
  0x27   : > { %s147_s3 = sshll.u32 %s139_s18, 4  ;;  %p726_p2 = pnand %p388_p3, %p696_p6  ;;  %s722_s3 = int_to_ptr.vmem [resolvable:$true] %s147_s3 }
  0x28   : > { %s136_s25 = scalar_lea.sflag [#allocation3], %s135_s23  ;;  %s459_s5 = scalar_lea.hbm %s720_s30, 128 }
  0x29   : > { %p460_p11 = scmp.ne.s32.totalorder %s720_s30, %s459_s5  ;;  %p461_p12 = pneg %p726_p2 }
  0x2a   : > { %s464_s16 = scalar_lea.hbm %s837_s1, 256  ;;  %p465_p7 = scmp.lt.u32.totalorder %s720_s30, %s837_s1 }
  0x2b   : > { %p462_p13 = pnand %p461_p12, %p460_p11  ;;  %p466_p10 = scmp.lt.u32.totalorder %s464_s16, %s459_s5 }
  0x2c   : > { %p468_p3 = scmp.lt.u32.totalorder %s459_s5, %s720_s30 }
  0x2d   : > { %p463_p0 = pneg %p462_p13  ;;  %p467_p6 = por %p466_p10, %p465_p7 }
  0x2f   : > { %p469_p5 = por %p468_p3, %p467_p6 }
  0x31   : > { %p470_p9 = pnand %p469_p5, %p463_p0 }
  0x33   : > { %473 = shalt.err (!%p470_p9)
}
  0x34   : > { %s474_s23 = scalar_lea.vmem %s722_s3, 128  ;;  %s578_s27 = smov [#allocation6]  }
  0x35   : > { %p475_p11 = scmp.ne.s32.totalorder %s722_s3, %s474_s23  ;;  %s479_s28 = sshll.u32 %s578_s27, 4  ;;  %s480_s28 = int_to_ptr.vmem [resolvable:$false] %s479_s28 }
  0x36   : > { %s481_s29 = scalar_lea.vmem %s480_s28, 256  ;;  %p482_p1 = scmp.lt.s32.totalorder %s722_s3, %s480_s28 }
  0x37   : > { %p477_p13 = pnand %p475_p11, %p461_p12  ;;  %p483_p7 = scmp.lt.s32.totalorder %s481_s29, %s474_s23 }
  0x39   : > { %p478_p4 = pneg %p477_p13  ;;  %p484_p10 = por %p483_p7, %p482_p1 }
  0x3b   : > { %p485_p6 = pnand %p484_p10, %p478_p4 }
  0x3d   : > { %488 = shalt.err (!%p485_p6)
}
  0x3e   : > { %382 = dma.hbm_to_vmem [thread:$0]  (!%p726_p2), %s720_s30, 128, %s722_s3, %s136_s25  }
  0x3f   : > { %156 = sbr.rel (%p651_p8) target bundleno = 241 (0xf1), region = 28  ;;  %p853_p9 = scmp.ne.s32.totalorder (!%p651_p8), %s843_s17, 0 }
  0x46   : > { %542 = dma.done.wait (%p853_p9), [#allocation5], 16  }
  0x47   : > { %544 = vsyncadd (%p853_p9), [#allocation5], 4294967280  ;;  %s762_s18 = sand.u32 1, %s559_s10   ;;  %p854_p1 = scmp.ne.s32.totalorder %s845_s19, 0 }
  0x48   : > { %s360_s4 = sshll.u32 %s762_s18, 3  ;;  %s163_s5 = scalar_lea.sflag [#allocation3], %s762_s18 }
  0x49   : > { %s166_s30 = scalar_lea.vmem [#allocation6], %s360_s4 }
  0x4a   : > { %546 = dma.done.wait (%p854_p1), %s163_s5, 128  }
  0x4b   : > { %548 = vsyncadd (%p854_p1), %s163_s5, 4294967168 }
  0x4c   : > { %171 = sfence }
  0x4d   : > { %v197_v0 = vlaneseq  ;;  %v196_v1 = vld [vmem:[%s166_s30] sm:$0xff]  ;;  %s579_s17 = smov 1   ;;  %s362_s21 = sshll.u32 %s567_s12, 2 }
  0x4e   : > { %203 = vrot.lane.b32.xlu1 %v196_v1, %s579_s17  ;;  %s189_s3 = sld [smem:[#allocation2 + %s362_s21]]  ;;  %s190_s25 = sadd.s32 1, %s362_s21 }
  0x4f   : > { %v198_v2 = vand.u32 127, %v197_v0  ;;  %s191_s6 = sld [smem:[#allocation2 + %s190_s25]]  ;;  %s192_s7 = sadd.s32 2, %s362_s21 }
  0x50   : > { %s580_s16 = smov 127   ;;  %s193_s8 = sld [smem:[#allocation2 + %s192_s7]] }
  0x51   : > { %205 = vrot.lane.b32.xlu0 %v198_v2, %s580_s16  ;;  %v199_v3 = vand.u32 1, %v198_v2  ;;  %s194_s24 = sadd.s32 3, %s362_s21  ;;  %v207_v15 = vadd.s32 1, %v198_v2  ;;  %s364_s19 = sshll.u32 %s567_s12, 7 }
  0x52   : > { %s195_s23 = sld [smem:[#allocation2 + %s194_s24]]  ;;  %s187_s27 = scalar_lea.vmem [#allocation7], %s360_s4 }
  0x53   : > { %vm200_vm0 = vcmp.eq.s32.totalorder %v199_v3, 0  ;;  %s259_s28 = sshll.u32 %s187_s27, 4  ;;  %s785_s30 = scalar_lea.hbm %s838_s2, %s364_s19  ;;  %s787_s28 = int_to_ptr.vmem [resolvable:$true] %s259_s28 }
  0x54   : > { %v210_v4 = vstv %s189_s3  ;;  %s245_s12 = scalar_lea.sflag [#allocation4], %s762_s18  ;;  %s489_s4 = scalar_lea.vmem %s787_s28, 128 }
  0x55   : > { %201 = vrot.lane.b32.xlu0 %v196_v1, %s580_s16  ;;  %v213_v5 = vstv %s191_s6  ;;  %p490_p4 = scmp.ne.s32.totalorder %s787_s28, %s489_s4  ;;  %p857_p8 = scmp.ne.s32.totalorder %s851_s15, 0 }
  0x56   : > { %v211_v6 = vstv %s193_s8  ;;  %s581_s17 = smov [#allocation7]  }
  0x57   : > { %v212_v7 = vsel %vm200_vm0, %v210_v4, %v211_v6  ;;  %v216_v17 = vsel %vm200_vm0, %v211_v6, %v210_v4  ;;  %p491_p2 = pnand %p490_p4, %p857_p8  ;;  %s493_s21 = sshll.u32 %s581_s17, 4  ;;  %s494_s21 = int_to_ptr.vmem [resolvable:$false] %s493_s21 }
  0x58   : > { %v214_v8 = vstv %s195_s23  ;;  %v218_v10 = vsub.f32 %v196_v1, %v212_v7  ;;  %s495_s3 = scalar_lea.vmem %s494_s21, 256  ;;  %p496_p0 = scmp.lt.s32.totalorder %s787_s28, %s494_s21 }
  0x59   : > { %v215_v9 = vsel %vm200_vm0, %v213_v5, %v214_v8  ;;  %v217_v18 = vsel %vm200_vm0, %v214_v8, %v213_v5  ;;  %p492_p12 = pneg %p491_p2  ;;  %p497_p3 = scmp.lt.s32.totalorder %s495_s3, %s489_s4 }
  0x5a   : > { %v219_v11 = vsub.f32 %v215_v9, %v196_v1 }
  0x5b   : > { %p498_p5 = por %p497_p3, %p496_p0 }
  0x5c   : > { %v222_v12 = vmin.f32 %v218_v10, %v219_v11  ;;  %v223_v13 = vmax.f32 %v218_v10, %v219_v11 }
  0x5d   : > { %p499_p11 = pnand %p498_p5, %p492_p12 }
  0x5e   : > { %vm226_vm2 = vcmp.gt.f32.partialorder %v222_v12, 0.0 }
  0xc0   : > { %v204_v16 = vpop.permute.xlu1 %203 }
  0xc3   : > { %v206_v14 = vpop.permute.xlu0 %205 }
  0xc4   : > { %vm208_vm1 = vcmp.eq.s32.totalorder %v206_v14, %v207_v15 }
  0xc7   : > { %v202_v19 = vpop.permute.xlu0 %201 }
  0xc8   : > { %v209_v20 = vsel %vm208_vm1, %v202_v19, %v204_v16 }
  0xc9   : > { %v220_v21 = vsub.f32 %v209_v20, %v216_v17  ;;  %v221_v22 = vsub.f32 %v217_v18, %v209_v20 }
  0xcb   : > { %v224_v23 = vmin.f32 %v220_v21, %v221_v22  ;;  %v225_v24 = vmax.f32 %v220_v21, %v221_v22 }
  0xcd   : > { %v229_v25 = vmul.f32 %v224_v23, %v222_v12  ;;  %v231_v26 = vmul.f32 %v225_v24, %v223_v13  ;;  %vm227_vm3 = vcmp.gt.f32.partialorder %v224_v23, 0.0 }
  0xce   : > { %vm773_vm4 = vmand %vm226_vm2, %vm227_vm3 }
  0xcf   : > { %v230_v28 = vmax.f32 %v229_v25, 0.0  ;;  %v232_v29 = vsel %vm773_vm4, %v231_v26, 1.0 }
  0xd1   : > { %442 = vrsqrt.f32 %v230_v28  ;;  %vm235_vm5 = vcmp.eq.f32.partialorder %v230_v28, inf  ;;  %v238_v32 = vand.u32 2147483648, %v230_v28  ;;  %vm237_vm6 = vcmp.eq.f32.partialorder %v230_v28, 0.0 }
  0xd2   : > { %444 = vrsqrt.f32 %v232_v29 }
  0xdb   : > { %v443_v30 = vpop.eup %442 }
  0xdc   : > { %v234_v31 = vmul.f32 %v443_v30, %v230_v28  ;;  %v445_v34 = vpop.eup %444 }
  0xde   : > { %v236_v33 = vsel %vm235_vm5, %v230_v28, %v234_v31 }
  0xdf   : > { %v239_v35 = vsel %vm237_vm6, %v238_v32, %v236_v33 }
  0xe0   : > { %v241_v36 = vmul.f32 %v445_v34, %v239_v35 }
  0xe2   : > { %v242_v37 = vsel %vm773_vm4, %v241_v36, -1.0 }
  0xe3   : > { %243 = vst [vmem:[%s187_s27] sm:$0xff] %v242_v37 }
  0xe4   : > { %502 = shalt.err (!%p499_p11)
}
  0xe5   : > { %s503_s18 = scalar_lea.hbm %s785_s30, 128  ;;  %s507_s7 = scalar_lea.hbm %s838_s2, 256 }
  0xe6   : > { %p504_p13 = scmp.ne.s32.totalorder %s785_s30, %s503_s18  ;;  %p508_p6 = scmp.lt.u32.totalorder %s785_s30, %s838_s2 }
  0xe7   : > { %p509_p9 = scmp.lt.u32.totalorder %s507_s7, %s503_s18  ;;  %p511_p4 = scmp.lt.u32.totalorder %s503_s18, %s785_s30 }
  0xe8   : > { %p505_p7 = pnand %p504_p13, %p857_p8 }
  0xe9   : > { %p510_p1 = por %p509_p9, %p508_p6 }
  0xea   : > { %p506_p10 = pneg %p505_p7 }
  0xeb   : > { %p512_p2 = por %p511_p4, %p510_p1 }
  0xed   : > { %p513_p12 = pnand %p512_p2, %p506_p10 }
  0xef   : > { %516 = shalt.err (!%p513_p12)
}
  0xf0   : > { %373 = dma.vmem_to_hbm [thread:$0]  (%p857_p8), %s787_s28, 128, %s785_s30, %s245_s12  }
  0xf1 PF: > { %s271_s24 = sand.u32 1, %s555_s9   ;;  %p858_p0 = scmp.ne.s32.totalorder %s846_s20, 0 }
  0xf2   : > { %p859_p3 = scmp.ge.s32.totalorder %s575_s14, 2  ;;  %s272_s23 = scalar_lea.sflag [#allocation4], %s271_s24 }
  0xf4   : > { %p384_p5 = pnand %p859_p3, %p858_p0 }
  0xf6   : > { %550 = dma.done.wait (!%p384_p5), %s272_s23, 128  }
  0xf7   : > { %552 = vsyncadd (!%p384_p5), %s272_s23, 4294967168  ;;  %s19_s14 = sadd.s32 1, %s575_s14   ;;  %s860_s9 = smov %s559_s10 }
  0xf8   : > { %p16_p11 = scmp.ge.s32.totalorder %s19_s14, 4   ;;  %s861_s10 = smov %s563_s11 }
  0xf9   : > { %s862_s11 = smov %s714_s26  ;;  %s863_s12 = smov %s571_s13 }
  0xfa   : > { %s864_s13 = smov %s866_s22  ;;  %18 = sbr.rel (!%p16_p11) target bundleno = 7 (0x7), region = 78 }
 0x101   :  { %277 = vsyncpa [#allocation3], 1 }
 0x102   :  { %279 = vsyncpa [#allocation3 + $0x1], 1 }
 0x103   :  { %280 = vsyncpa [#allocation4], 1 }
 0x104   :  { %282 = vsyncpa [#allocation4 + $0x1], 1 }
 0x105   :  { %283 = vsyncpa [#allocation5], 1 }
 0x106   :  { %285 = vsyncpa [#allocation5 + $0x1], 1 }

</bundles_post_ra>
